<compile_context>
chip_gen: v6e
topology: v6e:2x2x1
jax: 0.10.0
libtpu: 0.0.40
codegen_flags: <defaults>
</compile_context>

<pallas_src>
import jax
import jax.numpy as jnp
from jax.experimental import pallas as pl
from jax.experimental.pallas import tpu as pltpu

LANE = 128      # TPU lane width: pad output feature dims to this for dense stores.
SUBLANE = 8     # f32 sublane quantum: pad the batch dim to this in the wrapper.
MAX_TB = 256    # batch tile (rows); >=256 fills the v6e/v7x MXU, trivially VMEM-safe.


def _round_up(n, m):
    return ((n + m - 1) // m) * m


# ------------------------------- kernels ------------------------------------


def _hidden_kernel(x_ref, w_sh_ref, b_sh_ref, hidden_ref):
    """hidden = relu(x @ W_shared + b_shared) for one batch tile."""
    w = w_sh_ref[...]
    h = jnp.dot(x_ref[...].astype(w.dtype), w, preferred_element_type=jnp.float32)
    hidden_ref[...] = jnp.maximum(h + b_sh_ref[...], 0.0).astype(hidden_ref.dtype)


def _head_kernel(x_ref, w_sh_ref, b_sh_ref, w_hd_ref, b_hd_ref, head_ref):
    """head = relu(x@Wsh+bsh) @ [W_actor | W_critic] + b_head.

    `hidden` stays in VMEM/vregs only -- no dead HBM writeback for the
    get_value / get_action_logits / get_logits_and_value entry points.
    """
    w_sh = w_sh_ref[...]
    h = jnp.dot(x_ref[...].astype(w_sh.dtype), w_sh, preferred_element_type=jnp.float32)
    h = jnp.maximum(h + b_sh_ref[...], 0.0)
    w_hd = w_hd_ref[...]
    o = jnp.dot(h.astype(w_hd.dtype), w_hd, preferred_element_type=jnp.float32)
    head_ref[...] = (o + b_hd_ref[...]).astype(head_ref.dtype)


def _fused_kernel(x_ref, w_sh_ref, b_sh_ref, w_hd_ref, b_hd_ref,
                  hidden_ref, head_ref):
    """Both hidden and head outputs, used only when the caller wants everything."""
    w_sh = w_sh_ref[...]
    h = jnp.dot(x_ref[...].astype(w_sh.dtype), w_sh, preferred_element_type=jnp.float32)
    h = jnp.maximum(h + b_sh_ref[...], 0.0)
    hidden_ref[...] = h.astype(hidden_ref.dtype)
    w_hd = w_hd_ref[...]
    o = jnp.dot(h.astype(w_hd.dtype), w_hd, preferred_element_type=jnp.float32)
    head_ref[...] = (o + b_hd_ref[...]).astype(head_ref.dtype)


# ------------------------------- wrappers -----------------------------------

_PARALLEL = pltpu.CompilerParams(dimension_semantics=("parallel",))


def _nbytes(*arrays):
    return int(sum(a.size * a.dtype.itemsize for a in arrays))


def _shared_in_specs(tb, in_dim, h_pad):
    return [
        pl.BlockSpec((tb, in_dim), lambda i: (i, 0)),      # x: tiled along batch
        pl.BlockSpec((in_dim, h_pad), lambda i: (0, 0)),   # W_shared: resident
        pl.BlockSpec((1, h_pad), lambda i: (0, 0)),        # b_shared: resident (f32)
    ]


def _head_in_specs(h_pad, out_pad):
    return [
        pl.BlockSpec((h_pad, out_pad), lambda i: (0, 0)),  # [W_actor | W_critic]
        pl.BlockSpec((1, out_pad), lambda i: (0, 0)),      # [b_actor | b_critic] (f32)
    ]


def call_hidden(x_p, w_sh, b_sh, tb):
    bp, in_dim = x_p.shape
    h_pad = w_sh.shape[1]
    cost = pl.CostEstimate(
        flops=2 * bp * in_dim * h_pad, transcendentals=0,
        bytes_accessed=_nbytes(x_p, w_sh, b_sh) + bp * h_pad * 4)
    return pl.pallas_call(
        _hidden_kernel,
        out_shape=jax.ShapeDtypeStruct((bp, h_pad), jnp.float32),
        grid=(bp // tb,),
        in_specs=_shared_in_specs(tb, in_dim, h_pad),
        out_specs=pl.BlockSpec((tb, h_pad), lambda i: (i, 0)),
        compiler_params=_PARALLEL,
        cost_estimate=cost,
    )(x_p, w_sh, b_sh)


def call_head(x_p, w_sh, b_sh, w_hd, b_hd, tb):
    bp, in_dim = x_p.shape
    h_pad = w_sh.shape[1]
    out_pad = w_hd.shape[1]
    cost = pl.CostEstimate(
        flops=2 * bp * (in_dim * h_pad + h_pad * out_pad), transcendentals=0,
        bytes_accessed=_nbytes(x_p, w_sh, b_sh, w_hd, b_hd) + bp * out_pad * 4)
    return pl.pallas_call(
        _head_kernel,
        out_shape=jax.ShapeDtypeStruct((bp, out_pad), jnp.float32),
        grid=(bp // tb,),
        in_specs=_shared_in_specs(tb, in_dim, h_pad) + _head_in_specs(h_pad, out_pad),
        out_specs=pl.BlockSpec((tb, out_pad), lambda i: (i, 0)),
        compiler_params=_PARALLEL,
        cost_estimate=cost,
    )(x_p, w_sh, b_sh, w_hd, b_hd)


def call_fused(x_p, w_sh, b_sh, w_hd, b_hd, tb):
    bp, in_dim = x_p.shape
    h_pad = w_sh.shape[1]
    out_pad = w_hd.shape[1]
    cost = pl.CostEstimate(
        flops=2 * bp * (in_dim * h_pad + h_pad * out_pad), transcendentals=0,
        bytes_accessed=(_nbytes(x_p, w_sh, b_sh, w_hd, b_hd)
                        + bp * (h_pad + out_pad) * 4))
    return pl.pallas_call(
        _fused_kernel,
        out_shape=(jax.ShapeDtypeStruct((bp, h_pad), jnp.float32),
                   jax.ShapeDtypeStruct((bp, out_pad), jnp.float32)),
        grid=(bp // tb,),
        in_specs=_shared_in_specs(tb, in_dim, h_pad) + _head_in_specs(h_pad, out_pad),
        out_specs=(pl.BlockSpec((tb, h_pad), lambda i: (i, 0)),
                   pl.BlockSpec((tb, out_pad), lambda i: (i, 0))),
        compiler_params=_PARALLEL,
        cost_estimate=cost,
    )(x_p, w_sh, b_sh, w_hd, b_hd)


def _pad2d(a, rows, cols):
    out = jnp.zeros((rows, cols), a.dtype)
    return out.at[: a.shape[0], : a.shape[1]].set(a)


class ActorCriticPallas:
    """JAX/Pallas port of the PyTorch ActorCritic module.

    param_dtype=jnp.bfloat16 (default) stores the padded weight matrices in bf16
    (half the weight DMA bytes, native MXU path); biases/epilogue/accumulation
    stay f32.  Use param_dtype=jnp.float32 for exact parity with PyTorch f32.
    """

    def __init__(self, state_dim, action_dim, hidden_dim, key,
                 param_dtype=jnp.bfloat16):
        k1, k2, k3, k4, k5, k6 = jax.random.split(key, 6)

        def init_linear(kw, kb, fan_in, fan_out):
            # PyTorch nn.Linear default init: U(-1/sqrt(fan_in), 1/sqrt(fan_in)).
            bound = 1.0 / (fan_in ** 0.5)
            w = jax.random.uniform(kw, (fan_in, fan_out), jnp.float32, -bound, bound)
            b = jax.random.uniform(kb, (1, fan_out), jnp.float32, -bound, bound)
            return w, b

        self.state_dim = state_dim
        self.action_dim = action_dim
        self.hidden_dim = hidden_dim

        # Unpadded f32 parameters (reference / export). Weights stored [in, out]
        # (PyTorch W.T) so the kernel computes y = x @ W + b directly.
        self.w_shared, self.b_shared = init_linear(k1, k2, state_dim, hidden_dim)
        self.w_actor, self.b_actor = init_linear(k3, k4, hidden_dim, action_dim)
        self.w_critic, self.b_critic = init_linear(k5, k6, hidden_dim, 1)

        # Lane-dense padded parameters used by the kernels. Zero-padded shared
        # columns + zero bias + ReLU guarantee the padded hidden lanes are exactly
        # 0, so padded head-weight rows contribute nothing.
        self.h_pad = _round_up(hidden_dim, LANE)
        self.out_pad = _round_up(action_dim + 1, LANE)

        self.w_shared_p = _pad2d(self.w_shared, state_dim, self.h_pad).astype(param_dtype)
        self.b_shared_p = _pad2d(self.b_shared, 1, self.h_pad)            # f32 epilogue

        w_head = jnp.concatenate([self.w_actor, self.w_critic], axis=1)   # [H, A+1]
        b_head = jnp.concatenate([self.b_actor, self.b_critic], axis=1)   # [1, A+1]
        self.w_head_p = _pad2d(w_head, self.h_pad, self.out_pad).astype(param_dtype)
        self.b_head_p = _pad2d(b_head, 1, self.out_pad)                   # f32 epilogue

    # -- batch handling: pad to the sublane quantum / tile size, slice rows off --
    def _prep(self, x):
        x = jnp.asarray(x, jnp.float32)
        squeeze = x.ndim == 1
        if squeeze:
            x = x[None, :]
        b = x.shape[0]
        tb = MAX_TB if b >= MAX_TB else _round_up(max(b, SUBLANE), SUBLANE)
        bp = _round_up(b, tb)
        if bp != b:
            x = jnp.zeros((bp, x.shape[1]), x.dtype).at[:b, :].set(x)
        return x, b, tb, squeeze

    # x = fc_shared(x)  ==  ReLU(Linear(state_dim -> hidden_dim)); one launch.
    def forward(self, x):
        xp, b, tb, squeeze = self._prep(x)
        hidden = call_hidden(xp, self.w_shared_p, self.b_shared_p, tb)
        hidden = hidden[:b, : self.hidden_dim]
        return hidden[0] if squeeze else hidden

    def _head(self, x):
        xp, b, tb, squeeze = self._prep(x)
        head = call_head(xp, self.w_shared_p, self.b_shared_p,
                         self.w_head_p, self.b_head_p, tb)
        return head[:b], squeeze

    def get_action_logits(self, x):
        head, squeeze = self._head(x)
        logits = head[:, : self.action_dim]
        return logits[0] if squeeze else logits

    def get_value(self, x):
        head, squeeze = self._head(x)
        value = head[:, self.action_dim: self.action_dim + 1]
        return value[0] if squeeze else value

    def get_logits_and_value(self, x):
        """Both heads from a single kernel launch (the common PPO step)."""
        head, squeeze = self._head(x)
        logits = head[:, : self.action_dim]
        value = head[:, self.action_dim: self.action_dim + 1]
        if squeeze:
            return logits[0], value[0]
        return logits, value

    def get_action(self, x, key):
        # Categorical sample / log_prob are plain JAX on the kernel's logits;
        # distribution sampling has no sensible MXU/VPU kernel form.
        logits = jnp.atleast_2d(self.get_action_logits(x))
        action = jax.random.categorical(key, logits, axis=-1)
        log_prob = jnp.take_along_axis(jax.nn.log_softmax(logits, axis=-1),
                                       action[:, None], axis=-1)[:, 0]
        # TODO(synk): torch's `.item()` host sync is replicated with int(); callers
        # that stay on-device should use get_action_logits + jax.random.categorical.
        return int(action[0]), log_prob[0]

    # Everything (hidden + both heads) in one launch; used when all are needed.
    def apply(self, x):
        xp, b, tb, squeeze = self._prep(x)
        hidden_p, head_p = call_fused(xp, self.w_shared_p, self.b_shared_p,
                                      self.w_head_p, self.b_head_p, tb)
        hidden = hidden_p[:b, : self.hidden_dim]
        logits = head_p[:b, : self.action_dim]
        value = head_p[:b, self.action_dim: self.action_dim + 1]
        if squeeze:
            return hidden[0], logits[0], value[0]
        return hidden, logits, value


# --------------------------------- main --------------------------------------


if __name__ == "__main__":
    state_dim, action_dim, hidden_dim = 16, 4, 32
    batch = 8

    key = jax.random.PRNGKey(0)
    k_param, k_x, k_act = jax.random.split(key, 3)
    x = jax.random.normal(k_x, (batch, state_dim), dtype=jnp.float32)

    # ---- f32 parameters: exact parity with the PyTorch reference --------------
    model32 = ActorCriticPallas(state_dim, action_dim, hidden_dim, k_param,
                                param_dtype=jnp.float32)

    hidden, logits, value = model32.apply(x)
    jax.block_until_ready((hidden, logits, value))

    ref_hidden = jnp.maximum(x @ model32.w_shared + model32.b_shared, 0.0)
    ref_logits = ref_hidden @ model32.w_actor + model32.b_actor
    ref_value = ref_hidden @ model32.w_critic + model32.b_critic

    assert hidden.shape == (batch, hidden_dim)
    assert logits.shape == (batch, action_dim)
    assert value.shape == (batch, 1)
    assert jnp.allclose(hidden, ref_hidden, atol=1e-5, rtol=1e-5)
    assert jnp.allclose(logits, ref_logits, atol=1e-5, rtol=1e-5)
    assert jnp.allclose(value, ref_value, atol=1e-5, rtol=1e-5)

    # Per-method entry points: one launch each, no dead hidden writeback.
    assert jnp.allclose(model32.forward(x), ref_hidden, atol=1e-5, rtol=1e-5)
    assert jnp.allclose(model32.get_value(x), ref_value, atol=1e-5, rtol=1e-5)
    assert jnp.allclose(model32.get_action_logits(x), ref_logits, atol=1e-5, rtol=1e-5)
    lg, vl = model32.get_logits_and_value(x)
    assert jnp.allclose(lg, ref_logits, atol=1e-5, rtol=1e-5)
    assert jnp.allclose(vl, ref_value, atol=1e-5, rtol=1e-5)

    # Odd (non-multiple-of-8) batch: wrapper pads to the sublane quantum, slices off.
    assert jnp.allclose(model32.get_value(x[:5]), ref_value[:5], atol=1e-5, rtol=1e-5)

    # Single-state (1-D) input + sampling path, as in the original get_action().
    action, log_prob = model32.get_action(x[0], k_act)
    assert 0 <= action < action_dim
    jax.block_until_ready(log_prob)

    # ---- default bf16 weights: half the weight DMA, native MXU path -----------
    model_bf16 = ActorCriticPallas(state_dim, action_dim, hidden_dim, k_param)
    h16, l16, v16 = model_bf16.apply(x)
    jax.block_until_ready((h16, l16, v16))
    assert jnp.allclose(h16, ref_hidden, atol=5e-2, rtol=5e-2)
    assert jnp.allclose(l16, ref_logits, atol=5e-2, rtol=5e-2)
    assert jnp.allclose(v16, ref_value, atol=5e-2, rtol=5e-2)

    print("KERNEL_OK")
</pallas_src>

<mosaic_0001>
module attributes {stable_mosaic.version = 11 : i64} {
  func.func @_fused_kernel(%arg0: i32, %arg1: memref<8x16xf32, #tpu.memory_space<vmem>>, %arg2: memref<16x128xf32, #tpu.memory_space<vmem>>, %arg3: memref<1x128xf32, #tpu.memory_space<vmem>>, %arg4: memref<128x128xf32, #tpu.memory_space<vmem>>, %arg5: memref<1x128xf32, #tpu.memory_space<vmem>>, %arg6: memref<8x128xf32, #tpu.memory_space<vmem>>, %arg7: memref<8x128xf32, #tpu.memory_space<vmem>>) attributes {dimension_semantics = [#tpu.dimension_semantics<parallel>], iteration_bounds = array<i64: 1>, scalar_prefetch = 0 : i64, scratch_operands = 0 : i64, tpu.core_type = #tpu.core_type<tc>, window_params = [{transform_indices = @transform_0, window_bounds = array<i64: 8, 16>}, {pipeline_mode = #tpu.pipeline_mode<synchronous>, transform_indices = @transform_1, window_bounds = array<i64: 16, 128>}, {pipeline_mode = #tpu.pipeline_mode<synchronous>, transform_indices = @transform_2, window_bounds = array<i64: 1, 128>}, {pipeline_mode = #tpu.pipeline_mode<synchronous>, transform_indices = @transform_3, window_bounds = array<i64: 128, 128>}, {pipeline_mode = #tpu.pipeline_mode<synchronous>, transform_indices = @transform_4, window_bounds = array<i64: 1, 128>}, {transform_indices = @transform_5, window_bounds = array<i64: 8, 128>}, {transform_indices = @transform_6, window_bounds = array<i64: 8, 128>}]} {
    %c0 = arith.constant 0 : index
    %c0_0 = arith.constant 0 : index
    %0 = vector.load %arg2[%c0, %c0_0] : memref<16x128xf32, #tpu.memory_space<vmem>>, vector<16x128xf32>
    %c0_1 = arith.constant 0 : index
    %c0_2 = arith.constant 0 : index
    %1 = vector.load %arg1[%c0_1, %c0_2] : memref<8x16xf32, #tpu.memory_space<vmem>>, vector<8x16xf32>
    %cst = arith.constant dense<0.000000e+00> : vector<8x128xf32>
    %2 = tpu.matmul %1, %0, %cst {dimension_numbers = #tpu.dot_dimension_numbers<[1], [0], [0], [1], [0, 0, 1, 1], [], []>} : vector<8x16xf32>, vector<16x128xf32>, vector<8x128xf32> -> vector<8x128xf32>
    %c0_3 = arith.constant 0 : index
    %c0_4 = arith.constant 0 : index
    %3 = vector.load %arg3[%c0_3, %c0_4] : memref<1x128xf32, #tpu.memory_space<vmem>>, vector<1x128xf32>
    %4 = vector.broadcast %3 : vector<1x128xf32> to vector<8x128xf32>
    %5 = arith.addf %2, %4 : vector<8x128xf32>
    %cst_5 = arith.constant 0.000000e+00 : f32
    %6 = vector.broadcast %cst_5 : f32 to vector<8x128xf32>
    %7 = arith.maximumf %5, %6 : vector<8x128xf32>
    %c0_6 = arith.constant 0 : index
    %c0_7 = arith.constant 0 : index
    %8 = vector.load %arg6[%c0_6, %c0_7] : memref<8x128xf32, #tpu.memory_space<vmem>>, vector<8x128xf32>
    tpu.vector_store %arg6[%c0_6, %c0_7], %7 {strides = array<i32>} : memref<8x128xf32, #tpu.memory_space<vmem>>, vector<8x128xf32>,
    %c0_8 = arith.constant 0 : index
    %c0_9 = arith.constant 0 : index
    %9 = vector.load %arg4[%c0_8, %c0_9] : memref<128x128xf32, #tpu.memory_space<vmem>>, vector<128x128xf32>
    %cst_10 = arith.constant dense<0.000000e+00> : vector<8x128xf32>
    %10 = tpu.matmul %7, %9, %cst_10 {dimension_numbers = #tpu.dot_dimension_numbers<[1], [0], [0], [1], [0, 0, 1, 1], [], []>} : vector<8x128xf32>, vector<128x128xf32>, vector<8x128xf32> -> vector<8x128xf32>
    %c0_11 = arith.constant 0 : index
    %c0_12 = arith.constant 0 : index
    %11 = vector.load %arg5[%c0_11, %c0_12] : memref<1x128xf32, #tpu.memory_space<vmem>>, vector<1x128xf32>
    %12 = vector.broadcast %11 : vector<1x128xf32> to vector<8x128xf32>
    %13 = arith.addf %10, %12 : vector<8x128xf32>
    %c0_13 = arith.constant 0 : index
    %c0_14 = arith.constant 0 : index
    %14 = vector.load %arg7[%c0_13, %c0_14] : memref<8x128xf32, #tpu.memory_space<vmem>>, vector<8x128xf32>
    tpu.vector_store %arg7[%c0_13, %c0_14], %13 {strides = array<i32>} : memref<8x128xf32, #tpu.memory_space<vmem>>, vector<8x128xf32>,
    return
  }
  func.func @transform_0(%arg0: i32) -> (i32, i32) {
    %c0_i32 = arith.constant 0 : i32
    %c0_i32_0 = arith.constant 0 : i32
    return %arg0, %c0_i32 : i32, i32
  }
  func.func @transform_1(%arg0: i32) -> (i32, i32) {
    %c0_i32 = arith.constant 0 : i32
    %c0_i32_0 = arith.constant 0 : i32
    %c0_i32_1 = arith.constant 0 : i32
    return %c0_i32, %c0_i32_0 : i32, i32
  }
  func.func @transform_2(%arg0: i32) -> (i32, i32) {
    %c0_i32 = arith.constant 0 : i32
    %c0_i32_0 = arith.constant 0 : i32
    %c0_i32_1 = arith.constant 0 : i32
    return %c0_i32, %c0_i32_0 : i32, i32
  }
  func.func @transform_3(%arg0: i32) -> (i32, i32) {
    %c0_i32 = arith.constant 0 : i32
    %c0_i32_0 = arith.constant 0 : i32
    %c0_i32_1 = arith.constant 0 : i32
    return %c0_i32, %c0_i32_0 : i32, i32
  }
  func.func @transform_4(%arg0: i32) -> (i32, i32) {
    %c0_i32 = arith.constant 0 : i32
    %c0_i32_0 = arith.constant 0 : i32
    %c0_i32_1 = arith.constant 0 : i32
    return %c0_i32, %c0_i32_0 : i32, i32
  }
  func.func @transform_5(%arg0: i32) -> (i32, i32) {
    %c0_i32 = arith.constant 0 : i32
    %c0_i32_0 = arith.constant 0 : i32
    return %arg0, %c0_i32 : i32, i32
  }
  func.func @transform_6(%arg0: i32) -> (i32, i32) {
    %c0_i32 = arith.constant 0 : i32
    %c0_i32_0 = arith.constant 0 : i32
    return %arg0, %c0_i32 : i32, i32
  }
}

</mosaic_0001>

<bundles_post_ra>
// kernel: tpu_custom_call.1
= control target key start
LH: loop header
LB: loop body
LE: loop exit
PB: predicated region body
PF: predicated region fallthrough
CT: control target
= control target key end

     0   :  { %12 = vsyncpa [#allocation3], 0  ;;  %s520_s0 = inlined_call_operand.hbm [shape: f32[8,16], index: 0, kind: input, shape index: {}]   ;;  %s521_s1 = inlined_call_operand.hbm [shape: f32[16,128], index: 1, kind: input, shape index: {}]   ;;  %s522_s2 = inlined_call_operand.vmem [shape: f32[1,128], index: 2, kind: input, shape index: {}]   ;;  %s523_s3 = inlined_call_operand.hbm [shape: f32[128,128], index: 3, kind: input, shape index: {}]   ;;  %s524_s4 = inlined_call_operand.vmem [shape: f32[1,128], index: 4, kind: input, shape index: {}]   ;;  %s525_s5 = inlined_call_operand.hbm [shape: f32[8,128], index: 5, kind: output, shape index: {0}]   ;;  %s526_s6 = inlined_call_operand.hbm [shape: f32[8,128], index: 6, kind: output, shape index: {1}]  }
   0x1   :  { %13 = vsyncpa [#allocation6], 0 }
   0x2   :  { %14 = vsyncpa [#allocation4], 0 }
   0x3   :  { %15 = vsyncpa [#allocation10], 0  ;;  %s455_s21 = smov [#allocation5]  }
   0x4   :  { %s31_s22 = sshll.u32 %s455_s21, 4  ;;  %s32_s22 = int_to_ptr.vmem [resolvable:$true] %s31_s22 }
   0x5   :  { %s355_s23 = scalar_lea.vmem %s32_s22, 256  ;;  %p360_p1 = scmp.lt.s32.totalorder %s32_s22, %s32_s22 }
   0x6   :  { %p356_p0 = scmp.ne.s32.totalorder %s32_s22, %s355_s23  ;;  %p361_p2 = scmp.lt.s32.totalorder %s355_s23, %s355_s23 }
   0x8   :  { %p362_p3 = por %p361_p2, %p360_p1 }
   0xa   :  { %p363_p4 = pnand %p362_p3, %p356_p0 }
   0xc   :  { %366 = shalt.err (!%p363_p4)
}
   0xd   :  { %s456_s24 = smov 128   ;;  %s457_s25 = smov 8  }
   0xe   :  { %37 = dma.hbm_to_vmem [thread:$0]  %s521_s1, 256, %s32_s22, [#allocation6], %s456_s24, %s456_s24, %s457_s25  }
   0xf   :  { %s458_s28 = smov [#allocation2]   ;;  %s459_s30 = smov [#allocation7]  }
  0x10   :  { %s22_s29 = sshll.u32 %s458_s28, 4  ;;  %s45_s7 = sshll.u32 %s459_s30, 4  ;;  %s23_s29 = int_to_ptr.vmem [resolvable:$true] %s22_s29  ;;  %s46_s7 = int_to_ptr.vmem [resolvable:$true] %s45_s7 }
  0x11   :  { %s375_s8 = scalar_lea.vmem %s23_s29, 128  ;;  %p380_p6 = scmp.lt.s32.totalorder %s23_s29, %s23_s29 }
  0x12   :  { %p376_p5 = scmp.ne.s32.totalorder %s23_s29, %s375_s8  ;;  %p381_p7 = scmp.lt.s32.totalorder %s375_s8, %s375_s8 }
  0x14   :  { %p382_p8 = por %p381_p7, %p380_p6 }
  0x16   :  { %p383_p9 = pnand %p382_p8, %p376_p5 }
  0x18   :  { %386 = shalt.err (!%p383_p9)
}
  0x19   :  { %25 = dma.hbm_to_vmem [thread:$0]  %s520_s0, 128, %s23_s29, [#allocation3]  }
  0x1a   :  { %s395_s11 = scalar_lea.vmem %s46_s7, 2048  ;;  %p400_p11 = scmp.lt.s32.totalorder %s46_s7, %s46_s7 }
  0x1b   :  { %p396_p10 = scmp.ne.s32.totalorder %s46_s7, %s395_s11  ;;  %p401_p12 = scmp.lt.s32.totalorder %s395_s11, %s395_s11 }
  0x1d   :  { %p402_p13 = por %p401_p12, %p400_p11 }
  0x1f   :  { %p403_p0 = pnand %p402_p13, %p396_p10 }
  0x21   :  { %406 = shalt.err (!%p403_p0)
}
  0x22   :  { %51 = dma.hbm_to_vmem [thread:$0]  %s523_s3, 2048, %s46_s7, [#allocation6], %s456_s24, %s456_s24, %s457_s25  }
  0x23   :  { %447 = dma.done.wait [#allocation3], 128  }
  0x24   :  { %448 = vsyncadd [#allocation3], 4294967168 }
  0x25   :  { %449 = dma.done.wait [#allocation6], 2304  }
  0x26   :  { %450 = vsyncadd [#allocation6], 4294964992  ;;  %v460_v0 = vmov 0.0   ;;  %vm461_vm0 = vmmov 0   ;;  %v64_v1 = vld [vmem:[#allocation5 + $0x8] sm:$0xff]  ;;  %v63_v2 = vld [vmem:[#allocation5] sm:$0xff] }
  0x27   :  { %296 = vmatprep.subr.mxu0 %v460_v0  ;;  %300 = vmatprep.mubr.msk.f32.mxu0 %vm461_vm0, %v460_v0  ;;  %v65_v3 = vld [vmem:[#allocation2] sm:$0xff]  ;;  %vm73_vm1 = vcmask 130048   ;;  %v164_v4 = vld [vmem:[#allocation7 + $0x78] sm:$0xff]  ;;  %v163_v5 = vld [vmem:[#allocation7 + $0x70] sm:$0xff]  ;;  %s462_s13 = smov [#allocation8]  }
  0x28   :  { %303 = vmatprep.subr.mxu1 %v460_v0  ;;  %335 = vmatprep.mubr.msk.f32.mxu1 %vm461_vm0, %v460_v0  ;;  %v162_v6 = vld [vmem:[#allocation7 + $0x68] sm:$0xff]  ;;  %v161_v7 = vld [vmem:[#allocation7 + $0x60] sm:$0xff]  ;;  %v160_v8 = vld [vmem:[#allocation7 + $0x58] sm:$0xff]  ;;  %s249_s14 = sshll.u32 %s462_s13, 4  ;;  %s250_s14 = int_to_ptr.vmem [resolvable:$true] %s249_s14 }
  0x29   :  { %297 = vmatpush3.msra.mxu0 %v64_v1  ;;  %304 = vmatpush3.msra.mxu1 %v164_v4  ;;  %v159_v9 = vld [vmem:[#allocation7 + $0x50] sm:$0xff]  ;;  %v158_v10 = vld [vmem:[#allocation7 + $0x48] sm:$0xff]  ;;  %v157_v11 = vld [vmem:[#allocation7 + $0x40] sm:$0xff]  ;;  %s407_s15 = scalar_lea.vmem %s250_s14, 128  ;;  %p412_p2 = scmp.lt.s32.totalorder %s250_s14, %s250_s14 }
  0x2a   :  { %298 = vmatprep.subr.mxu0 %v460_v0  ;;  %305 = vmatprep.subr.mxu1 %v460_v0  ;;  %v156_v12 = vld [vmem:[#allocation7 + $0x38] sm:$0xff]  ;;  %v155_v13 = vld [vmem:[#allocation7 + $0x30] sm:$0xff]  ;;  %v154_v14 = vld [vmem:[#allocation7 + $0x28] sm:$0xff]  ;;  %p408_p1 = scmp.ne.s32.totalorder %s250_s14, %s407_s15  ;;  %p413_p3 = scmp.lt.s32.totalorder %s407_s15, %s407_s15 }
  0x2b   :  { %299 = vmatpush3.msra.mxu0 %v63_v2  ;;  %306 = vmatpush3.msra.mxu1 %v163_v5  ;;  %v153_v15 = vld [vmem:[#allocation7 + $0x20] sm:$0xff]  ;;  %v152_v16 = vld [vmem:[#allocation7 + $0x18] sm:$0xff]  ;;  %v151_v17 = vld [vmem:[#allocation7 + $0x10] sm:$0xff] }
  0x2c   :  { %301 = vmatmul.mubr.msk.f32.vlgmr.msra.gmra.mxu0 %vm73_vm1, %v65_v3  ;;  %307 = vmatprep.subr.mxu1 %v460_v0  ;;  %v150_v18 = vld [vmem:[#allocation7 + $0x8] sm:$0xff]  ;;  %v149_v19 = vld [vmem:[#allocation7] sm:$0xff]  ;;  %p414_p4 = por %p413_p3, %p412_p2 }
  0x2d   :  { %308 = vmatpush3.msra.mxu1 %v162_v6  ;;  %v273_v20 = vld [vmem:[%s522_s2] ss:$0 sm:$0xff] }
  0x2e   :  { %309 = vmatprep.subr.mxu1 %v460_v0  ;;  %p415_p5 = pnand %p414_p4, %p408_p1 }
  0x2f   :  { %310 = vmatpush3.msra.mxu1 %v161_v7 }
  0x30   :  { %311 = vmatprep.subr.mxu1 %v460_v0 }
  0x31   :  { %312 = vmatpush3.msra.mxu1 %v160_v8 }
  0x32   :  { %313 = vmatprep.subr.mxu1 %v460_v0 }
  0x33   :  { %314 = vmatpush3.msra.mxu1 %v159_v9 }
  0x34   :  { %315 = vmatprep.subr.mxu1 %v460_v0 }
  0x35   :  { %316 = vmatpush3.msra.mxu1 %v158_v10 }
  0x36   :  { %317 = vmatprep.subr.mxu1 %v460_v0 }
  0x37   :  { %318 = vmatpush3.msra.mxu1 %v157_v11 }
  0x38   :  { %319 = vmatprep.subr.mxu1 %v460_v0 }
  0x39   :  { %320 = vmatpush3.msra.mxu1 %v156_v12 }
  0x3a   :  { %321 = vmatprep.subr.mxu1 %v460_v0 }
  0x3b   :  { %322 = vmatpush3.msra.mxu1 %v155_v13 }
  0x3c   :  { %323 = vmatprep.subr.mxu1 %v460_v0 }
  0x3d   :  { %324 = vmatpush3.msra.mxu1 %v154_v14 }
  0x3e   :  { %325 = vmatprep.subr.mxu1 %v460_v0 }
  0x3f   :  { %326 = vmatpush3.msra.mxu1 %v153_v15 }
  0x40   :  { %327 = vmatprep.subr.mxu1 %v460_v0 }
  0x41   :  { %328 = vmatpush3.msra.mxu1 %v152_v16 }
  0x42   :  { %329 = vmatprep.subr.mxu1 %v460_v0 }
  0x43   :  { %330 = vmatpush3.msra.mxu1 %v151_v17 }
  0x44   :  { %331 = vmatprep.subr.mxu1 %v460_v0 }
  0x45   :  { %332 = vmatpush3.msra.mxu1 %v150_v18 }
  0x46   :  { %333 = vmatprep.subr.mxu1 %v460_v0 }
  0x47   :  { %334 = vmatpush3.msra.mxu1 %v149_v19 }
  0xec   :  { %v143_v21 = vpop.f32.mrf.mxu0 }
  0xed   :  { %v144_v22 = vadd.f32 %v273_v20, %v143_v21 }
  0xee   :  { %v302_v23 = vpop.f32.mrf.mxu0 }
  0xef   :  { %v147_v24 = vmax.f32 %v144_v22, 0.0 }
  0xf1   :  { %148 = vst [vmem:[#allocation8] sm:$0xff] %v147_v24  ;;  %336 = vmatmul.mubr.f32.vlgmr.msra.gmra.mxu1 %v147_v24 }
  0xf2   :  { %418 = shalt.err (!%p415_p5)
}
  0xf3   :  { %252 = dma.vmem_to_hbm [thread:$0]  %s250_s14, 128, %s525_s5, [#allocation4]   ;;  %v275_v25 = vld [vmem:[%s524_s4] ss:$0 sm:$0xff] }
  0xf4   :  { %s463_s19 = smov [#allocation9]  }
  0xf5   :  { %s259_s20 = sshll.u32 %s463_s19, 4  ;;  %s260_s20 = int_to_ptr.vmem [resolvable:$true] %s259_s20 }
  0xf6   :  { %s427_s21 = scalar_lea.vmem %s260_s20, 128  ;;  %p432_p7 = scmp.lt.s32.totalorder %s260_s20, %s260_s20 }
  0xf7   :  { %p428_p6 = scmp.ne.s32.totalorder %s260_s20, %s427_s21  ;;  %p433_p8 = scmp.lt.s32.totalorder %s427_s21, %s427_s21 }
  0xf9   :  { %p434_p9 = por %p433_p8, %p432_p7 }
  0xfb   :  { %p435_p10 = pnand %p434_p9, %p428_p6 }
 0x1b1   :  { %v238_v26 = vpop.f32.mrf.mxu1 }
 0x1b2   :  { %v239_v27 = vadd.f32 %v275_v25, %v238_v26 }
 0x1b3   :  { %v337_v28 = vpop.f32.mrf.mxu1 }
 0x1b4   :  { %242 = vst [vmem:[#allocation9] sm:$0xff] %v239_v27 }
 0x1b5   :  { %438 = shalt.err (!%p435_p10)
}
 0x1b6   :  { %262 = dma.vmem_to_hbm [thread:$0]  %s260_s20, 128, %s526_s6, [#allocation10]  }
 0x1b7   :  { %451 = dma.done.wait [#allocation4], 128  }
 0x1b8   :  { %452 = vsyncadd [#allocation4], 4294967168 }
 0x1b9   :  { %453 = dma.done.wait [#allocation10], 128  }
 0x1ba   :  { %454 = vsyncadd [#allocation10], 4294967168 }
 0x1bb   :  { %269 = vsyncpa [#allocation3], 1 }
 0x1bc   :  { %270 = vsyncpa [#allocation6], 1 }
 0x1bd   :  { %271 = vsyncpa [#allocation4], 1 }
 0x1be   :  { %272 = vsyncpa [#allocation10], 1 }

</bundles_post_ra>
